<compile_context>
chip_gen: v7x
topology: tpu7x:2x2x1
jax: 0.10.0
libtpu: 0.0.40
codegen_flags: <defaults>
</compile_context>

<pallas_src>
import warnings
from functools import partial

import jax
import jax.numpy as jnp
from jax.experimental import pallas as pl
from jax.experimental.pallas import tpu as pltpu

# Suppress the benign "donated buffer not usable" warning when B % 8 != 0
# forces a padded copy (donation is a perf intent only).
warnings.filterwarnings("ignore", message="Some donated buffers were not usable")

ISIZE = 4
HSIZES = (32, 32)
NBACTIONS = 2
REC_LAYER_IN = 0
REC_LAYER_OUT = 1
REC_SIZE = HSIZES[0]          # inputsizes[rec_layer_out] == hsizes[0]
RR = REC_SIZE * REC_SIZE      # flat (lane-dense) hebb width = 1024
CLIPVAL = 2.0
LANE = 128                    # lane-dense fused-output slab width


def hebbian_kernel(x_ref, rv_ref, hebbf_ref,
                   w0_ref, b0_ref, w1_ref, b1_ref,
                   wcomb_ref, bcomb_ref,
                   wplast_ref, alphaf_ref,
                   wh2mod_ref, bh2mod_ref, wmodfan_ref, bmodfan_ref,
                   expand_ref, tilem_ref, sel_ref,
                   ra_ref, hebbf_out_ref):
    x = x_ref[...]            # (TB, ISIZE)
    rv = rv_ref[...]          # (TB, R)
    hebbf = hebbf_ref[...]    # (TB, R*R) lane-dense flat hebb: [b, i*R+j] = hebb[b,i,j]

    # rv_rep[b, i*R+j] = rv[b, i]   (tiny MXU matmul against 0/1 expansion matrix)
    rv_rep = jnp.dot(rv, expand_ref[...], preferred_element_type=jnp.float32)   # (TB, R*R)

    # ---- layer 0 (rec_layer_in): fixed + plastic recurrent injection --------
    # rv @ (w + alpha*hebb)  ==  rv @ w   (shared weights, MXU)
    #                          + sum_i rv[:,i]*alpha[i,:]*hebb[:,i,:]  (flat, lane-dense)
    pre0 = jnp.dot(x, w0_ref[...], preferred_element_type=jnp.float32) + b0_ref[...]
    rec_fixed = jnp.dot(rv, wplast_ref[...], preferred_element_type=jnp.float32)
    rec_plastic = jnp.dot(rv_rep * alphaf_ref[...] * hebbf, sel_ref[...],
                          preferred_element_type=jnp.float32)                   # (TB, R)
    h0 = jnp.tanh(pre0 + rec_fixed + rec_plastic)

    # ---- layer 1 (rec_layer_out) ---------------------------------------------
    h1 = jnp.tanh(jnp.dot(h0, w1_ref[...], preferred_element_type=jnp.float32)
                  + b1_ref[...])

    # ---- fused rec_layer + output layer: one lane-dense 128-wide MXU matmul --
    # ra[:, :R] = rec_layer(h1),  ra[:, R:R+NBACTIONS] = layers[-1](h1)
    ra = jnp.dot(h1, wcomb_ref[...], preferred_element_type=jnp.float32) + bcomb_ref[...]
    ra_ref[...] = ra
    rlv = ra[:, :REC_SIZE]

    # ---- neuromodulated Hebbian trace update (flat, lane-dense) --------------
    eta_s = jnp.tanh(jnp.sum(rlv * wh2mod_ref[...], axis=-1, keepdims=True)
                     + bh2mod_ref[...])                           # (TB, 1)
    eta = eta_s * wmodfan_ref[...] + bmodfan_ref[...]             # (TB, R)
    srlv = eta * rlv                                              # (TB, R)
    # srlv_tile[b, i*R+j] = srlv[b, j]
    srlv_tile = jnp.dot(srlv, tilem_ref[...], preferred_element_type=jnp.float32)  # (TB, R*R)
    hebbf_out_ref[...] = jnp.clip(hebbf + rv_rep * srlv_tile, -CLIPVAL, CLIPVAL)


def _round_up(n, m):
    return ((n + m - 1) // m) * m


def _choose_tile(B, block_b):
    """Pick a batch-tile size (multiple of 8) dividing the 8-rounded batch.

    Avoids padded copies / re-slices of the dominant hebb tensor for awkward
    batch sizes, and prefers >= 2 tiles so a v7x chip can feed both
    TensorCores via the "parallel" grid axis.
    """
    block_b = max(8, block_b)
    Bp = _round_up(B, 8)
    limit = min(block_b, Bp)
    cands = [t for t in range(8, limit + 1, 8) if Bp % t == 0]
    TB = max(cands)
    if Bp // TB < 2:
        two_plus = [t for t in cands if Bp // t >= 2]
        if two_plus:
            TB = max(two_plus)
    return TB, Bp


@partial(jax.jit, static_argnames=("block_b",), donate_argnums=(2,))
def hebbian_forward(x, rv, hebb, params, block_b=512):
    (w0, b0, w1, b1, w2, b2, wrec, brec,
     wplast, alpha, wh2mod, bh2mod, wmodfan, bmodfan) = params
    B = x.shape[0]
    R = REC_SIZE

    # Fuse rec_layer (R->R) and the output layer (R->NBACTIONS) into a single
    # lane-dense (R, 128) weight / (1, 128) bias (zero-padded).
    wcomb = jnp.zeros((R, LANE), jnp.float32)
    wcomb = wcomb.at[:, :R].set(wrec)
    wcomb = wcomb.at[:, R:R + NBACTIONS].set(w2)
    bcomb = jnp.zeros((1, LANE), jnp.float32)
    bcomb = bcomb.at[:, :R].set(brec)
    bcomb = bcomb.at[:, R:R + NBACTIONS].set(b2)

    # Lane-dense flat-hebb algebra constants (compile-time folded):
    #   expand[i, i*R+j] = 1   -> rv @ expand  repeats rv[i] over a block of R lanes
    #   tilem [j, i*R+j] = 1   -> srlv @ tilem tiles srlv across the i blocks
    #   sel = tilem.T          -> (prod @ sel)[b, j] = sum_i prod[b, i*R+j]
    eye = jnp.eye(R, dtype=jnp.float32)
    expand = jnp.repeat(eye, R, axis=1)       # (R, R*R)
    tilem = jnp.tile(eye, (1, R))              # (R, R*R)
    sel = tilem.T                              # (R*R, R)
    alphaf = alpha.reshape(1, RR)

    hebbf = hebb.reshape(B, RR)                # lane-dense flat hebb

    TB, Bp = _choose_tile(B, block_b)
    if Bp != B:                                # only sublane rounding (B % 8 != 0)
        pad = Bp - B
        x = jnp.pad(x, ((0, pad), (0, 0)))
        rv = jnp.pad(rv, ((0, pad), (0, 0)))
        hebbf = jnp.pad(hebbf, ((0, pad), (0, 0)))
    nb = Bp // TB

    def batched(feat):
        return pl.BlockSpec((TB, feat), lambda i: (i, 0))

    def resident(arr):
        return pl.BlockSpec(arr.shape, lambda i, _n=arr.ndim: (0,) * _n)

    in_specs = [
        batched(ISIZE),                 # x
        batched(R),                     # rv
        batched(RR),                    # hebb (flat, lane-dense)
        resident(w0), resident(b0),
        resident(w1), resident(b1),
        resident(wcomb), resident(bcomb),
        resident(wplast), resident(alphaf),
        resident(wh2mod), resident(bh2mod),
        resident(wmodfan), resident(bmodfan),
        resident(expand), resident(tilem), resident(sel),
    ]
    out_shape = (
        jax.ShapeDtypeStruct((Bp, LANE), jnp.float32),   # [rlv | act | 0] fused slab
        jax.ShapeDtypeStruct((Bp, RR), jnp.float32),     # hebb' (flat)
    )
    out_specs = (batched(LANE), batched(RR))

    ra, hebbf_new = pl.pallas_call(
        hebbian_kernel,
        grid=(nb,),
        in_specs=in_specs,
        out_shape=out_shape,
        out_specs=out_specs,
        input_output_aliases={2: 1},     # hebb trace updated in place (donated)
        compiler_params=pltpu.CompilerParams(
            dimension_semantics=("parallel",),
            vmem_limit_bytes=48 * 1024 * 1024),
    )(x, rv, hebbf, w0, b0, w1, b1, wcomb, bcomb,
      wplast, alphaf, wh2mod, bh2mod, wmodfan, bmodfan,
      expand, tilem, sel)

    rlv = ra[:B, :R]
    act = ra[:B, R:R + NBACTIONS]
    hebb_new = hebbf_new[:B].reshape(B, R, R)
    return act, rlv, hebb_new


def ref_forward(x, rv, hebb, params):
    (w0, b0, w1, b1, w2, b2, wrec, brec,
     wplast, alpha, wh2mod, bh2mod, wmodfan, bmodfan) = params
    pre0 = x @ w0 + b0
    plastic = wplast[None] + alpha[None] * hebb
    rec_in = jnp.einsum('br,brq->bq', rv, plastic)
    h0 = jnp.tanh(pre0 + rec_in)
    h1 = jnp.tanh(h0 @ w1 + b1)
    rlv = h1 @ wrec + brec
    act = h1 @ w2 + b2
    myeta = jnp.tanh(jnp.sum(rlv * wh2mod, -1, keepdims=True) + bh2mod)
    myeta = myeta * wmodfan + bmodfan
    deltahebb = rv[:, :, None] * rlv[:, None, :]
    hebb_new = jnp.clip(hebb + myeta[:, None, :] * deltahebb, -CLIPVAL, CLIPVAL)
    return act, rlv, hebb_new


def init_params(key):
    inputsizes = (ISIZE,) + HSIZES            # [4, 32, 32]
    outputsizes = HSIZES + (NBACTIONS,)       # [32, 32, 2]
    ks = jax.random.split(key, 16)

    def linear(kw, kb, fan_in, fan_out):
        bound = 1.0 / jnp.sqrt(fan_in)
        w = jax.random.uniform(kw, (fan_in, fan_out), jnp.float32, -bound, bound)
        b = jax.random.uniform(kb, (1, fan_out), jnp.float32, -bound, bound)
        return w, b

    w0, b0 = linear(ks[0], ks[1], inputsizes[0], outputsizes[0])
    w1, b1 = linear(ks[2], ks[3], inputsizes[1], outputsizes[1])
    w2, b2 = linear(ks[4], ks[5], inputsizes[2], outputsizes[2])
    wrec, brec = linear(ks[6], ks[7], REC_SIZE, REC_SIZE)
    wplast = 0.001 * jax.random.uniform(ks[8], (REC_SIZE, REC_SIZE), jnp.float32)
    alpha = 0.001 * jax.random.uniform(ks[9], (REC_SIZE, REC_SIZE), jnp.float32)
    # h2mod: Linear(R, 1) stored as a (1, R) row; modfanout: Linear(1, R) -> (1, R) row.
    bnd_h = 1.0 / jnp.sqrt(REC_SIZE)
    wh2mod = jax.random.uniform(ks[10], (1, REC_SIZE), jnp.float32, -bnd_h, bnd_h)
    bh2mod = jax.random.uniform(ks[11], (1, 1), jnp.float32, -bnd_h, bnd_h)
    wmodfan = jax.random.uniform(ks[12], (1, REC_SIZE), jnp.float32, -1.0, 1.0)
    bmodfan = jax.random.uniform(ks[13], (1, REC_SIZE), jnp.float32, -1.0, 1.0)
    return (w0, b0, w1, b1, w2, b2, wrec, brec,
            wplast, alpha, wh2mod, bh2mod, wmodfan, bmodfan)


if __name__ == "__main__":
    key = jax.random.PRNGKey(0)
    params = init_params(jax.random.fold_in(key, 1))

    def run_case(B, block_b):
        kx, krv, kh = jax.random.split(jax.random.fold_in(key, 100 + B), 3)
        x = jax.random.normal(kx, (B, ISIZE), jnp.float32)
        rv = jax.random.normal(krv, (B, REC_SIZE), jnp.float32)
        hebb = 0.01 * jax.random.normal(kh, (B, REC_SIZE, REC_SIZE), jnp.float32)

        # Reference first: hebb is donated to (and invalidated by) the kernel call.
        act_r, rlv_r, hebb_r = ref_forward(x, rv, hebb, params)

        act, rlv, hebb_new = hebbian_forward(x, rv, hebb, params, block_b=block_b)
        jax.block_until_ready((act, rlv, hebb_new))

        assert jnp.allclose(act, act_r, atol=1e-5, rtol=1e-5)
        assert jnp.allclose(rlv, rlv_r, atol=1e-5, rtol=1e-5)
        assert jnp.allclose(hebb_new, hebb_r, atol=1e-5, rtol=1e-5)

    run_case(B=2, block_b=512)    # spec-sized case (single 8-row tile, padded sublanes)
    run_case(B=16, block_b=512)   # exercises the "split into >=2 tiles" (v7x megacore) path
    run_case(B=40, block_b=16)    # multi-tile grid, no hebb padding, in-place hebb aliasing
    print("KERNEL_OK")
</pallas_src>

<mosaic_0001>
module attributes {stable_mosaic.version = 11 : i64} {
  func.func @hebbian_kernel(%arg0: i32, %arg1: memref<8x4xf32, #tpu.memory_space<vmem>>, %arg2: memref<8x32xf32, #tpu.memory_space<vmem>>, %arg3: memref<8x1024xf32, #tpu.memory_space<vmem>>, %arg4: memref<4x32xf32, #tpu.memory_space<vmem>>, %arg5: memref<1x32xf32, #tpu.memory_space<vmem>>, %arg6: memref<32x32xf32, #tpu.memory_space<vmem>>, %arg7: memref<1x32xf32, #tpu.memory_space<vmem>>, %arg8: memref<32x128xf32, #tpu.memory_space<vmem>>, %arg9: memref<1x128xf32, #tpu.memory_space<vmem>>, %arg10: memref<32x32xf32, #tpu.memory_space<vmem>>, %arg11: memref<1x1024xf32, #tpu.memory_space<vmem>>, %arg12: memref<1x32xf32, #tpu.memory_space<vmem>>, %arg13: memref<1x1xf32, #tpu.memory_space<vmem>>, %arg14: memref<1x32xf32, #tpu.memory_space<vmem>>, %arg15: memref<1x32xf32, #tpu.memory_space<vmem>>, %arg16: memref<32x1024xf32, #tpu.memory_space<vmem>>, %arg17: memref<32x1024xf32, #tpu.memory_space<vmem>>, %arg18: memref<1024x32xf32, #tpu.memory_space<vmem>>, %arg19: memref<8x128xf32, #tpu.memory_space<vmem>>, %arg20: memref<8x1024xf32, #tpu.memory_space<vmem>>) attributes {dimension_semantics = [#tpu.dimension_semantics<parallel>], iteration_bounds = array<i64: 1>, scalar_prefetch = 0 : i64, scratch_operands = 0 : i64, tpu.core_type = #tpu.core_type<tc>, window_params = [{transform_indices = @transform_0, window_bounds = array<i64: 8, 4>}, {transform_indices = @transform_1, window_bounds = array<i64: 8, 32>}, {transform_indices = @transform_2, window_bounds = array<i64: 8, 1024>}, {pipeline_mode = #tpu.pipeline_mode<synchronous>, transform_indices = @transform_3, window_bounds = array<i64: 4, 32>}, {pipeline_mode = #tpu.pipeline_mode<synchronous>, transform_indices = @transform_4, window_bounds = array<i64: 1, 32>}, {pipeline_mode = #tpu.pipeline_mode<synchronous>, transform_indices = @transform_5, window_bounds = array<i64: 32, 32>}, {pipeline_mode = #tpu.pipeline_mode<synchronous>, transform_indices = @transform_6, window_bounds = array<i64: 1, 32>}, {pipeline_mode = #tpu.pipeline_mode<synchronous>, transform_indices = @transform_7, window_bounds = array<i64: 32, 128>}, {pipeline_mode = #tpu.pipeline_mode<synchronous>, transform_indices = @transform_8, window_bounds = array<i64: 1, 128>}, {pipeline_mode = #tpu.pipeline_mode<synchronous>, transform_indices = @transform_9, window_bounds = array<i64: 32, 32>}, {pipeline_mode = #tpu.pipeline_mode<synchronous>, transform_indices = @transform_10, window_bounds = array<i64: 1, 1024>}, {pipeline_mode = #tpu.pipeline_mode<synchronous>, transform_indices = @transform_11, window_bounds = array<i64: 1, 32>}, {pipeline_mode = #tpu.pipeline_mode<synchronous>, transform_indices = @transform_12, window_bounds = array<i64: 1, 1>}, {pipeline_mode = #tpu.pipeline_mode<synchronous>, transform_indices = @transform_13, window_bounds = array<i64: 1, 32>}, {pipeline_mode = #tpu.pipeline_mode<synchronous>, transform_indices = @transform_14, window_bounds = array<i64: 1, 32>}, {pipeline_mode = #tpu.pipeline_mode<synchronous>, transform_indices = @transform_15, window_bounds = array<i64: 32, 1024>}, {pipeline_mode = #tpu.pipeline_mode<synchronous>, transform_indices = @transform_16, window_bounds = array<i64: 32, 1024>}, {pipeline_mode = #tpu.pipeline_mode<synchronous>, transform_indices = @transform_17, window_bounds = array<i64: 1024, 32>}, {transform_indices = @transform_18, window_bounds = array<i64: 8, 128>}, {transform_indices = @transform_19, window_bounds = array<i64: 8, 1024>}]} {
    %c0 = arith.constant 0 : index
    %c0_0 = arith.constant 0 : index
    %0 = vector.load %arg1[%c0, %c0_0] : memref<8x4xf32, #tpu.memory_space<vmem>>, vector<8x4xf32>
    %c0_1 = arith.constant 0 : index
    %c0_2 = arith.constant 0 : index
    %1 = vector.load %arg2[%c0_1, %c0_2] : memref<8x32xf32, #tpu.memory_space<vmem>>, vector<8x32xf32>
    %c0_3 = arith.constant 0 : index
    %c0_4 = arith.constant 0 : index
    %2 = vector.load %arg3[%c0_3, %c0_4] : memref<8x1024xf32, #tpu.memory_space<vmem>>, vector<8x1024xf32>
    %c0_5 = arith.constant 0 : index
    %c0_6 = arith.constant 0 : index
    %3 = vector.load %arg16[%c0_5, %c0_6] : memref<32x1024xf32, #tpu.memory_space<vmem>>, vector<32x1024xf32>
    %cst = arith.constant dense<0.000000e+00> : vector<8x1024xf32>
    %4 = tpu.matmul %1, %3, %cst {dimension_numbers = #tpu.dot_dimension_numbers<[1], [0], [0], [1], [0, 0, 1, 1], [], []>} : vector<8x32xf32>, vector<32x1024xf32>, vector<8x1024xf32> -> vector<8x1024xf32>
    %c0_7 = arith.constant 0 : index
    %c0_8 = arith.constant 0 : index
    %5 = vector.load %arg4[%c0_7, %c0_8] : memref<4x32xf32, #tpu.memory_space<vmem>>, vector<4x32xf32>
    %cst_9 = arith.constant dense<0.000000e+00> : vector<8x32xf32>
    %6 = tpu.matmul %0, %5, %cst_9 {dimension_numbers = #tpu.dot_dimension_numbers<[1], [0], [0], [1], [0, 0, 1, 1], [], []>} : vector<8x4xf32>, vector<4x32xf32>, vector<8x32xf32> -> vector<8x32xf32>
    %c0_10 = arith.constant 0 : index
    %c0_11 = arith.constant 0 : index
    %7 = vector.load %arg5[%c0_10, %c0_11] : memref<1x32xf32, #tpu.memory_space<vmem>>, vector<1x32xf32>
    %8 = vector.broadcast %7 : vector<1x32xf32> to vector<8x32xf32>
    %9 = arith.addf %6, %8 : vector<8x32xf32>
    %c0_12 = arith.constant 0 : index
    %c0_13 = arith.constant 0 : index
    %10 = vector.load %arg10[%c0_12, %c0_13] : memref<32x32xf32, #tpu.memory_space<vmem>>, vector<32x32xf32>
    %cst_14 = arith.constant dense<0.000000e+00> : vector<8x32xf32>
    %11 = tpu.matmul %1, %10, %cst_14 {dimension_numbers = #tpu.dot_dimension_numbers<[1], [0], [0], [1], [0, 0, 1, 1], [], []>} : vector<8x32xf32>, vector<32x32xf32>, vector<8x32xf32> -> vector<8x32xf32>
    %c0_15 = arith.constant 0 : index
    %c0_16 = arith.constant 0 : index
    %12 = vector.load %arg11[%c0_15, %c0_16] : memref<1x1024xf32, #tpu.memory_space<vmem>>, vector<1x1024xf32>
    %13 = vector.broadcast %12 : vector<1x1024xf32> to vector<8x1024xf32>
    %14 = arith.mulf %4, %13 : vector<8x1024xf32>
    %15 = arith.mulf %14, %2 : vector<8x1024xf32>
    %c0_17 = arith.constant 0 : index
    %c0_18 = arith.constant 0 : index
    %16 = vector.load %arg18[%c0_17, %c0_18] : memref<1024x32xf32, #tpu.memory_space<vmem>>, vector<1024x32xf32>
    %cst_19 = arith.constant dense<0.000000e+00> : vector<8x32xf32>
    %17 = tpu.matmul %15, %16, %cst_19 {dimension_numbers = #tpu.dot_dimension_numbers<[1], [0], [0], [1], [0, 0, 1, 1], [], []>} : vector<8x1024xf32>, vector<1024x32xf32>, vector<8x32xf32> -> vector<8x32xf32>
    %18 = arith.addf %9, %11 : vector<8x32xf32>
    %19 = arith.addf %18, %17 : vector<8x32xf32>
    %20 = math.tanh %19 : vector<8x32xf32>
    %c0_20 = arith.constant 0 : index
    %c0_21 = arith.constant 0 : index
    %21 = vector.load %arg6[%c0_20, %c0_21] : memref<32x32xf32, #tpu.memory_space<vmem>>, vector<32x32xf32>
    %cst_22 = arith.constant dense<0.000000e+00> : vector<8x32xf32>
    %22 = tpu.matmul %20, %21, %cst_22 {dimension_numbers = #tpu.dot_dimension_numbers<[1], [0], [0], [1], [0, 0, 1, 1], [], []>} : vector<8x32xf32>, vector<32x32xf32>, vector<8x32xf32> -> vector<8x32xf32>
    %c0_23 = arith.constant 0 : index
    %c0_24 = arith.constant 0 : index
    %23 = vector.load %arg7[%c0_23, %c0_24] : memref<1x32xf32, #tpu.memory_space<vmem>>, vector<1x32xf32>
    %24 = vector.broadcast %23 : vector<1x32xf32> to vector<8x32xf32>
    %25 = arith.addf %22, %24 : vector<8x32xf32>
    %26 = math.tanh %25 : vector<8x32xf32>
    %c0_25 = arith.constant 0 : index
    %c0_26 = arith.constant 0 : index
    %27 = vector.load %arg8[%c0_25, %c0_26] : memref<32x128xf32, #tpu.memory_space<vmem>>, vector<32x128xf32>
    %cst_27 = arith.constant dense<0.000000e+00> : vector<8x128xf32>
    %28 = tpu.matmul %26, %27, %cst_27 {dimension_numbers = #tpu.dot_dimension_numbers<[1], [0], [0], [1], [0, 0, 1, 1], [], []>} : vector<8x32xf32>, vector<32x128xf32>, vector<8x128xf32> -> vector<8x128xf32>
    %c0_28 = arith.constant 0 : index
    %c0_29 = arith.constant 0 : index
    %29 = vector.load %arg9[%c0_28, %c0_29] : memref<1x128xf32, #tpu.memory_space<vmem>>, vector<1x128xf32>
    %30 = vector.broadcast %29 : vector<1x128xf32> to vector<8x128xf32>
    %31 = arith.addf %28, %30 : vector<8x128xf32>
    %c0_30 = arith.constant 0 : index
    %c0_31 = arith.constant 0 : index
    %32 = vector.load %arg19[%c0_30, %c0_31] : memref<8x128xf32, #tpu.memory_space<vmem>>, vector<8x128xf32>
    tpu.vector_store %arg19[%c0_30, %c0_31], %31 {strides = array<i32>} : memref<8x128xf32, #tpu.memory_space<vmem>>, vector<8x128xf32>,
    %33 = vector.extract_strided_slice %31 {offsets = [0, 0], sizes = [8, 32], strides = [1, 1]} : vector<8x128xf32> to vector<8x32xf32>
    %c0_32 = arith.constant 0 : index
    %c0_33 = arith.constant 0 : index
    %34 = vector.load %arg12[%c0_32, %c0_33] : memref<1x32xf32, #tpu.memory_space<vmem>>, vector<1x32xf32>
    %35 = vector.broadcast %34 : vector<1x32xf32> to vector<8x32xf32>
    %36 = arith.mulf %33, %35 : vector<8x32xf32>
    %cst_34 = arith.constant dense<0.000000e+00> : vector<8xf32>
    %37 = vector.multi_reduction <add>, %36, %cst_34 [1] : vector<8x32xf32> to vector<8xf32>
    %38 = vector.shape_cast %37 : vector<8xf32> to vector<8x1xf32>
    %c0_35 = arith.constant 0 : index
    %c0_36 = arith.constant 0 : index
    %39 = vector.load %arg13[%c0_35, %c0_36] : memref<1x1xf32, #tpu.memory_space<vmem>>, vector<1x1xf32>
    %40 = vector.broadcast %39 : vector<1x1xf32> to vector<8x1xf32>
    %41 = arith.addf %38, %40 : vector<8x1xf32>
    %42 = math.tanh %41 : vector<8x1xf32>
    %c0_37 = arith.constant 0 : index
    %c0_38 = arith.constant 0 : index
    %43 = vector.load %arg14[%c0_37, %c0_38] : memref<1x32xf32, #tpu.memory_space<vmem>>, vector<1x32xf32>
    %44 = vector.broadcast %42 : vector<8x1xf32> to vector<8x32xf32>
    %45 = vector.broadcast %43 : vector<1x32xf32> to vector<8x32xf32>
    %46 = arith.mulf %44, %45 : vector<8x32xf32>
    %c0_39 = arith.constant 0 : index
    %c0_40 = arith.constant 0 : index
    %47 = vector.load %arg15[%c0_39, %c0_40] : memref<1x32xf32, #tpu.memory_space<vmem>>, vector<1x32xf32>
    %48 = vector.broadcast %47 : vector<1x32xf32> to vector<8x32xf32>
    %49 = arith.addf %46, %48 : vector<8x32xf32>
    %50 = arith.mulf %49, %33 : vector<8x32xf32>
    %c0_41 = arith.constant 0 : index
    %c0_42 = arith.constant 0 : index
    %51 = vector.load %arg17[%c0_41, %c0_42] : memref<32x1024xf32, #tpu.memory_space<vmem>>, vector<32x1024xf32>
    %cst_43 = arith.constant dense<0.000000e+00> : vector<8x1024xf32>
    %52 = tpu.matmul %50, %51, %cst_43 {dimension_numbers = #tpu.dot_dimension_numbers<[1], [0], [0], [1], [0, 0, 1, 1], [], []>} : vector<8x32xf32>, vector<32x1024xf32>, vector<8x1024xf32> -> vector<8x1024xf32>
    %53 = arith.mulf %4, %52 : vector<8x1024xf32>
    %54 = arith.addf %2, %53 : vector<8x1024xf32>
    %cst_44 = arith.constant -2.000000e+00 : f32
    %cst_45 = arith.constant 2.000000e+00 : f32
    %55 = vector.broadcast %cst_44 : f32 to vector<8x1024xf32>
    %56 = arith.maximumf %55, %54 : vector<8x1024xf32>
    %57 = vector.broadcast %cst_45 : f32 to vector<8x1024xf32>
    %58 = arith.minimumf %57, %56 : vector<8x1024xf32>
    %c0_46 = arith.constant 0 : index
    %c0_47 = arith.constant 0 : index
    %59 = vector.load %arg20[%c0_46, %c0_47] : memref<8x1024xf32, #tpu.memory_space<vmem>>, vector<8x1024xf32>
    tpu.vector_store %arg20[%c0_46, %c0_47], %58 {strides = array<i32>} : memref<8x1024xf32, #tpu.memory_space<vmem>>, vector<8x1024xf32>,
    return
  }
  func.func @transform_0(%arg0: i32) -> (i32, i32) {
    %c0_i32 = arith.constant 0 : i32
    %c0_i32_0 = arith.constant 0 : i32
    return %arg0, %c0_i32 : i32, i32
  }
  func.func @transform_1(%arg0: i32) -> (i32, i32) {
    %c0_i32 = arith.constant 0 : i32
    %c0_i32_0 = arith.constant 0 : i32
    return %arg0, %c0_i32 : i32, i32
  }
  func.func @transform_2(%arg0: i32) -> (i32, i32) {
    %c0_i32 = arith.constant 0 : i32
    %c0_i32_0 = arith.constant 0 : i32
    return %arg0, %c0_i32 : i32, i32
  }
  func.func @transform_3(%arg0: i32) -> (i32, i32) {
    %c0_i32 = arith.constant 0 : i32
    %c0_i32_0 = arith.constant 0 : i32
    %c0_i32_1 = arith.constant 0 : i32
    return %c0_i32, %c0_i32_0 : i32, i32
  }
  func.func @transform_4(%arg0: i32) -> (i32, i32) {
    %c0_i32 = arith.constant 0 : i32
    %c0_i32_0 = arith.constant 0 : i32
    %c0_i32_1 = arith.constant 0 : i32
    return %c0_i32, %c0_i32_0 : i32, i32
  }
  func.func @transform_5(%arg0: i32) -> (i32, i32) {
    %c0_i32 = arith.constant 0 : i32
    %c0_i32_0 = arith.constant 0 : i32
    %c0_i32_1 = arith.constant 0 : i32
    return %c0_i32, %c0_i32_0 : i32, i32
  }
  func.func @transform_6(%arg0: i32) -> (i32, i32) {
    %c0_i32 = arith.constant 0 : i32
    %c0_i32_0 = arith.constant 0 : i32
    %c0_i32_1 = arith.constant 0 : i32
    return %c0_i32, %c0_i32_0 : i32, i32
  }
  func.func @transform_7(%arg0: i32) -> (i32, i32) {
    %c0_i32 = arith.constant 0 : i32
    %c0_i32_0 = arith.constant 0 : i32
    %c0_i32_1 = arith.constant 0 : i32
    return %c0_i32, %c0_i32_0 : i32, i32
  }
  func.func @transform_8(%arg0: i32) -> (i32, i32) {
    %c0_i32 = arith.constant 0 : i32
    %c0_i32_0 = arith.constant 0 : i32
    %c0_i32_1 = arith.constant 0 : i32
    return %c0_i32, %c0_i32_0 : i32, i32
  }
  func.func @transform_9(%arg0: i32) -> (i32, i32) {
    %c0_i32 = arith.constant 0 : i32
    %c0_i32_0 = arith.constant 0 : i32
    %c0_i32_1 = arith.constant 0 : i32
    return %c0_i32, %c0_i32_0 : i32, i32
  }
  func.func @transform_10(%arg0: i32) -> (i32, i32) {
    %c0_i32 = arith.constant 0 : i32
    %c0_i32_0 = arith.constant 0 : i32
    %c0_i32_1 = arith.constant 0 : i32
    return %c0_i32, %c0_i32_0 : i32, i32
  }
  func.func @transform_11(%arg0: i32) -> (i32, i32) {
    %c0_i32 = arith.constant 0 : i32
    %c0_i32_0 = arith.constant 0 : i32
    %c0_i32_1 = arith.constant 0 : i32
    return %c0_i32, %c0_i32_0 : i32, i32
  }
  func.func @transform_12(%arg0: i32) -> (i32, i32) {
    %c0_i32 = arith.constant 0 : i32
    %c0_i32_0 = arith.constant 0 : i32
    %c0_i32_1 = arith.constant 0 : i32
    return %c0_i32, %c0_i32_0 : i32, i32
  }
  func.func @transform_13(%arg0: i32) -> (i32, i32) {
    %c0_i32 = arith.constant 0 : i32
    %c0_i32_0 = arith.constant 0 : i32
    %c0_i32_1 = arith.constant 0 : i32
    return %c0_i32, %c0_i32_0 : i32, i32
  }
  func.func @transform_14(%arg0: i32) -> (i32, i32) {
    %c0_i32 = arith.constant 0 : i32
    %c0_i32_0 = arith.constant 0 : i32
    %c0_i32_1 = arith.constant 0 : i32
    return %c0_i32, %c0_i32_0 : i32, i32
  }
  func.func @transform_15(%arg0: i32) -> (i32, i32) {
    %c0_i32 = arith.constant 0 : i32
    %c0_i32_0 = arith.constant 0 : i32
    %c0_i32_1 = arith.constant 0 : i32
    return %c0_i32, %c0_i32_0 : i32, i32
  }
  func.func @transform_16(%arg0: i32) -> (i32, i32) {
    %c0_i32 = arith.constant 0 : i32
    %c0_i32_0 = arith.constant 0 : i32
    %c0_i32_1 = arith.constant 0 : i32
    return %c0_i32, %c0_i32_0 : i32, i32
  }
  func.func @transform_17(%arg0: i32) -> (i32, i32) {
    %c0_i32 = arith.constant 0 : i32
    %c0_i32_0 = arith.constant 0 : i32
    %c0_i32_1 = arith.constant 0 : i32
    return %c0_i32, %c0_i32_0 : i32, i32
  }
  func.func @transform_18(%arg0: i32) -> (i32, i32) {
    %c0_i32 = arith.constant 0 : i32
    %c0_i32_0 = arith.constant 0 : i32
    return %arg0, %c0_i32 : i32, i32
  }
  func.func @transform_19(%arg0: i32) -> (i32, i32) {
    %c0_i32 = arith.constant 0 : i32
    %c0_i32_0 = arith.constant 0 : i32
    return %arg0, %c0_i32 : i32, i32
  }
}

</mosaic_0001>

<bundles_post_ra>
// kernel: hebbian_forward.1
= control target key start
LH: loop header
LB: loop body
LE: loop exit
PB: predicated region body
PF: predicated region fallthrough
CT: control target
= control target key end

     0   :  { %v2045_v3 = vmov 0.0   ;;  %vm105_vm0 = vcmask 261120   ;;  %vm405_vm1 = vcmask 1043456   ;;  %v2046_v59 = vmov 0.0|0.0   ;;  %s2980_s15 = inlined_call_operand.vmem [shape: f32[32,1024], index: 15, kind: input, shape index: {}]   ;;  %s2981_s1 = inlined_call_operand.vmem [shape: f32[8,32], index: 1, kind: input, shape index: {}]   ;;  %s2982_s9 = inlined_call_operand.vmem [shape: f32[32,32], index: 9, kind: input, shape index: {}]   ;;  %s2983_s3 = inlined_call_operand.vmem [shape: f32[4,32], index: 3, kind: input, shape index: {}]   ;;  %s2984_s17 = inlined_call_operand.vmem [shape: f32[1024,32], index: 17, kind: input, shape index: {}]   ;;  %s2985_s0 = inlined_call_operand.vmem [shape: f32[8,4], index: 0, kind: input, shape index: {}]   ;;  %s2986_s10 = inlined_call_operand.vmem [shape: f32[1,1024], index: 10, kind: input, shape index: {}]   ;;  %s2987_s2 = inlined_call_operand.vmem [shape: f32[8,1024], index: 2, kind: input, shape index: {}, may-alias: {2,19}]   ;;  %s2988_s4 = inlined_call_operand.vmem [shape: f32[1,32], index: 4, kind: input, shape index: {}]   ;;  %s2989_s5 = inlined_call_operand.vmem [shape: f32[32,32], index: 5, kind: input, shape index: {}]   ;;  %s2990_s7 = inlined_call_operand.vmem [shape: f32[32,128], index: 7, kind: input, shape index: {}]   ;;  %s2991_s6 = inlined_call_operand.vmem [shape: f32[1,32], index: 6, kind: input, shape index: {}]   ;;  %s2992_s12 = inlined_call_operand.<no memory space> [shape: f32[1,1], index: 12, kind: input, shape index: {}]   ;;  %s2993_s8 = inlined_call_operand.vmem [shape: f32[1,128], index: 8, kind: input, shape index: {}]   ;;  %s2994_s11 = inlined_call_operand.vmem [shape: f32[1,32], index: 11, kind: input, shape index: {}]   ;;  %s2995_s18 = inlined_call_operand.vmem [shape: f32[8,128], index: 18, kind: output, shape index: {0}]   ;;  %s2996_s16 = inlined_call_operand.vmem [shape: f32[32,1024], index: 16, kind: input, shape index: {}]   ;;  %s2997_s13 = inlined_call_operand.vmem [shape: f32[1,32], index: 13, kind: input, shape index: {}]   ;;  %s2998_s14 = inlined_call_operand.vmem [shape: f32[1,32], index: 14, kind: input, shape index: {}]   ;;  %s2999_s19 = inlined_call_operand.vmem [shape: f32[8,1024], index: 19, kind: output, shape index: {1}, may-alias: {2,19}]  }
   0x1   :  { %3002 = sst [smem:[#allocation3_spill]] %s2980_s15  ;;  %173 = vmatprep.mubr.f32.mxu0 %v2045_v3  ;;  %244 = vmatprep.mubr.f32.mxu1 %v2045_v3  ;;  %v627_v53 = vld [vmem:[%s2984_s17 + $0x80] sm:$0xff]  ;;  %v628_v54 = vld [vmem:[%s2984_s17 + $0x88] sm:$0xff]  ;;  %v629_v61 = vld [vmem:[%s2984_s17 + $0x90] sm:$0xff]  ;;  %vm401_vm2 = vcmask 31744   ;;  %vm2047_vm3 = vmmov 0  }
   0x2   :  { %3003 = sst [smem:[#allocation4_spill]] %s2981_s1  ;;  %s3006_s20 = sld [smem:[#allocation3_spill]]  ;;  %v611_v57 = vld [vmem:[%s2984_s17] sm:$0xff]  ;;  %v612_v58 = vld [vmem:[%s2984_s17 + $0x8] sm:$0xff]  ;;  %v630_v62 = vld [vmem:[%s2984_s17 + $0x98] sm:$0xff]  ;;  %v1862_v63 = vpack.c.bf16 %v628_v54, %v627_v53 }
   0x3   :  { %3004 = sst [smem:[#allocation5_spill]] %s2982_s9  ;;  %s3007_s25 = sld [smem:[#allocation4_spill]]  ;;  %v651_v54 = vld [vmem:[%s2984_s17 + $0x140] sm:$0xff] }
   0x4   :  { %3005 = sst [smem:[#allocation6_spill]] %s2983_s3  ;;  %s3008_s29 = sld [smem:[#allocation5_spill]] }
   0x5   :  { %s3009_s1 = sld [smem:[#allocation6_spill]] }
   0x8   :  { %v74_v0 = vld [vmem:[%s3006_s20 + $0x8] sm:$0xff]  ;;  %v76_v2 = vld [vmem:[%s3006_s20 + $0x18] sm:$0xff]  ;;  %v73_v6 = vld [vmem:[%s3006_s20] sm:$0xff] }
   0x9   :  { %v82_v1 = vld [vmem:[%s3006_s20 + $0x48] sm:$0xff]  ;;  %v84_v5 = vld [vmem:[%s3006_s20 + $0x58] sm:$0xff]  ;;  %v81_v7 = vld [vmem:[%s3006_s20 + $0x40] sm:$0xff] }
   0xa   :  { %v1824_v4 = vpack.c.bf16 %v82_v1, %v74_v0  ;;  %v1832_v8 = vpack.c.bf16 %v84_v5, %v76_v2  ;;  %v1826_v9 = vpack.c.bf16 %v81_v7, %v73_v6  ;;  %v75_v10 = vld [vmem:[%s3006_s20 + $0x10] sm:$0xff]  ;;  %v90_v12 = vld [vmem:[%s3006_s20 + $0x88] sm:$0xff]  ;;  %v92_v15 = vld [vmem:[%s3006_s20 + $0x98] sm:$0xff]  ;;  %v1866_v7 = vpack.c.bf16 %v630_v62, %v629_v61 }
   0xb   :  { %v83_v11 = vld [vmem:[%s3006_s20 + $0x50] sm:$0xff]  ;;  %v98_v14 = vld [vmem:[%s3006_s20 + $0xc8] sm:$0xff]  ;;  %v100_v16 = vld [vmem:[%s3006_s20 + $0xd8] sm:$0xff] }
   0xc   :  { %1825 = vmatprep.subr.bf16.mxu0 %v1824_v4  ;;  %v1834_v13 = vpack.c.bf16 %v83_v11, %v75_v10  ;;  %1833 = vmatprep.subr.bf16.mxu1 %v1832_v8  ;;  %v1828_v17 = vpack.c.bf16 %v98_v14, %v90_v12  ;;  %v1836_v18 = vpack.c.bf16 %v100_v16, %v92_v15  ;;  %v89_v19 = vld [vmem:[%s3006_s20 + $0x80] sm:$0xff]  ;;  %v91_v21 = vld [vmem:[%s3006_s20 + $0x90] sm:$0xff]  ;;  %v78_v24 = vld [vmem:[%s3006_s20 + $0x28] sm:$0xff] }
   0xd   :  { %1827 = vmatpush1.bf16.msra.mxu0 %v1826_v9  ;;  %v97_v20 = vld [vmem:[%s3006_s20 + $0xc0] sm:$0xff]  ;;  %v99_v23 = vld [vmem:[%s3006_s20 + $0xd0] sm:$0xff]  ;;  %v86_v27 = vld [vmem:[%s3006_s20 + $0x68] sm:$0xff]  ;;  %v1864_v4 = vpack.c.bf16 %v612_v58, %v611_v57 }
   0xe   :  { %1835 = vmatpush1.bf16.msra.mxu1 %v1834_v13  ;;  %v1830_v22 = vpack.c.bf16 %v97_v20, %v89_v19  ;;  %1829 = vmatprep.subr.bf16.mxu0 %v1828_v17  ;;  %v1838_v25 = vpack.c.bf16 %v99_v23, %v91_v21  ;;  %v2205_v26 = vld [vmem:[%s3007_s25] sm:$0xff]  ;;  %v1840_v30 = vpack.c.bf16 %v86_v27, %v78_v24  ;;  %v80_v31 = vld [vmem:[%s3006_s20 + $0x38] sm:$0xff]  ;;  %v79_v33 = vld [vmem:[%s3006_s20 + $0x30] sm:$0xff] }
   0xf   :  { %1837 = vmatprep.subr.bf16.mxu1 %v1836_v18  ;;  %v77_v28 = vld [vmem:[%s3006_s20 + $0x20] sm:$0xff]  ;;  %v88_v32 = vld [vmem:[%s3006_s20 + $0x78] sm:$0xff]  ;;  %v87_v36 = vld [vmem:[%s3006_s20 + $0x70] sm:$0xff] }
  0x10   :  { %v85_v29 = vld [vmem:[%s3006_s20 + $0x60] sm:$0xff]  ;;  %v1848_v35 = vpack.c.bf16 %v88_v32, %v80_v31  ;;  %v94_v37 = vld [vmem:[%s3006_s20 + $0xa8] sm:$0xff]  ;;  %v1850_v39 = vpack.c.bf16 %v87_v36, %v79_v33  ;;  %v96_v43 = vld [vmem:[%s3006_s20 + $0xb8] sm:$0xff] }
  0x11   :  { %1831 = vmatpush1.bf16.msra.mxu0 %v1830_v22  ;;  %v1842_v34 = vpack.c.bf16 %v85_v29, %v77_v28  ;;  %v102_v38 = vld [vmem:[%s3006_s20 + $0xe8] sm:$0xff]  ;;  %v93_v41 = vld [vmem:[%s3006_s20 + $0xa0] sm:$0xff]  ;;  %v104_v44 = vld [vmem:[%s3006_s20 + $0xf8] sm:$0xff] }
  0x12   :  { %1839 = vmatpush1.bf16.msra.mxu1 %v1838_v25  ;;  %1841 = vmatprep.subr.bf16.mxu0 %v1840_v30  ;;  %v1844_v40 = vpack.c.bf16 %v102_v38, %v94_v37  ;;  %v101_v42 = vld [vmem:[%s3006_s20 + $0xe0] sm:$0xff]  ;;  %v95_v45 = vld [vmem:[%s3006_s20 + $0xb0] sm:$0xff]  ;;  %v1852_v47 = vpack.c.bf16 %v104_v44, %v96_v43  ;;  %v480_v51 = vld [vmem:[%s3008_s29 + $0x8] sm:$0xff] }
  0x13   :  { %1849 = vmatprep.subr.bf16.mxu1 %v1848_v35  ;;  %v103_v46 = vld [vmem:[%s3006_s20 + $0xf0] sm:$0xff]  ;;  %v1846_v48 = vpack.c.bf16 %v101_v42, %v93_v41  ;;  %v479_v50 = vld [vmem:[%s3008_s29] sm:$0xff]  ;;  %v482_v60 = vld [vmem:[%s3008_s29 + $0x18] sm:$0xff] }
  0x14   :  { %1601 = vmatmul.mubr.msk.f32.vlgmr.msra.gmra.mrb[0].mxu0 %vm105_vm0, %v2205_v26  ;;  %v1854_v49 = vpack.c.bf16 %v103_v46, %v95_v45  ;;  %v393_v52 = vld [vmem:[%s3009_s1] sm:$0xf]  ;;  %v1857_v55 = vpack.c.bf16 %v480_v51, %v479_v50  ;;  %v481_v56 = vld [vmem:[%s3008_s29 + $0x10] sm:$0xff]  ;;  %v660_v1 = vld [vmem:[%s2984_s17 + $0x188] sm:$0xff] }
  0x15   :  { %1602 = vmatmul.mubr.msk.f32.vlgmr.msra.gmra.mrb[0].mxu1 %vm105_vm0, %v2205_v26  ;;  %1843 = vmatpush1.bf16.msra.mxu0 %v1842_v34  ;;  %v659_v0 = vld [vmem:[%s2984_s17 + $0x180] sm:$0xff]  ;;  %v1860_v5 = vpack.c.bf16 %v482_v60, %v481_v56  ;;  %v613_v8 = vld [vmem:[%s2984_s17 + $0x10] sm:$0xff]  ;;  %v614_v9 = vld [vmem:[%s2984_s17 + $0x18] sm:$0xff] }
  0x16   :  { %1851 = vmatpush1.bf16.msra.mxu1 %v1850_v39  ;;  %1845 = vmatprep.subr.bf16.mxu0 %v1844_v40  ;;  %v63_v2 = vld [vmem:[%s2985_s0] sm:$0xff]  ;;  %v1894_v10 = vpack.c.bf16 %v660_v1, %v659_v0  ;;  %v644_v11 = vld [vmem:[%s2984_s17 + $0x108] sm:$0xff]  ;;  %v661_v14 = vld [vmem:[%s2984_s17 + $0x190] sm:$0xff]  ;;  %v1868_v16 = vpack.c.bf16 %v614_v9, %v613_v8 }
  0x17   :  { %1853 = vmatprep.subr.bf16.mxu1 %v1852_v47  ;;  %315 = vmatprep.mubr.f32.mxu0 %v2045_v3  ;;  %v643_v6 = vld [vmem:[%s2984_s17 + $0x100] sm:$0xff]  ;;  %v632_v13 = vld [vmem:[%s2984_s17 + $0xa8] sm:$0xff]  ;;  %v662_v15 = vld [vmem:[%s2984_s17 + $0x198] sm:$0xff] }
  0x18   :  { %386 = vmatprep.mubr.f32.mxu1 %v2045_v3  ;;  %v631_v12 = vld [vmem:[%s2984_s17 + $0xa0] sm:$0xff]  ;;  %v1896_v17 = vpack.c.bf16 %v644_v11, %v643_v6  ;;  %v645_v18 = vld [vmem:[%s2984_s17 + $0x110] sm:$0xff]  ;;  %v616_v21 = vld [vmem:[%s2984_s17 + $0x28] sm:$0xff]  ;;  %v1898_v22 = vpack.c.bf16 %v662_v15, %v661_v14 }
  0x19   :  { %1847 = vmatpush1.bf16.msra.mxu0 %v1846_v48  ;;  %v1870_v19 = vpack.c.bf16 %v632_v13, %v631_v12  ;;  %v615_v20 = vld [vmem:[%s2984_s17 + $0x20] sm:$0xff]  ;;  %v646_v23 = vld [vmem:[%s2984_s17 + $0x118] sm:$0xff]  ;;  %v633_v24 = vld [vmem:[%s2984_s17 + $0xb0] sm:$0xff] }
  0x1a   :  { %1855 = vmatpush1.bf16.msra.mxu1 %v1854_v49  ;;  %1786 = vmatprep.subr.mxu0 %v2045_v3  ;;  %v634_v25 = vld [vmem:[%s2984_s17 + $0xb8] sm:$0xff]  ;;  %v663_v27 = vld [vmem:[%s2984_s17 + $0x1a0] sm:$0xff]  ;;  %v664_v28 = vld [vmem:[%s2984_s17 + $0x1a8] sm:$0xff]  ;;  %v1872_v29 = vpack.c.bf16 %v616_v21, %v615_v20  ;;  %v1900_v30 = vpack.c.bf16 %v646_v23, %v645_v18 }
  0x1b   :  { %1856 = vmatprep.subr.bf16.mxu1 %v2046_v59  ;;  %v647_v31 = vld [vmem:[%s2984_s17 + $0x120] sm:$0xff]  ;;  %v1874_v32 = vpack.c.bf16 %v634_v25, %v633_v24  ;;  %v617_v33 = vld [vmem:[%s2984_s17 + $0x30] sm:$0xff]  ;;  %v618_v34 = vld [vmem:[%s2984_s17 + $0x38] sm:$0xff] }
  0x1c   :  { %1603 = vmatmul.mubr.msk.f32.vlgmr.msra.gmra.mrb[2].mxu0 %vm105_vm0, %v2205_v26  ;;  %v648_v35 = vld [vmem:[%s2984_s17 + $0x128] sm:$0xff]  ;;  %v635_v36 = vld [vmem:[%s2984_s17 + $0xc0] sm:$0xff]  ;;  %v665_v38 = vld [vmem:[%s2984_s17 + $0x1b0] sm:$0xff]  ;;  %v1876_v40 = vpack.c.bf16 %v618_v34, %v617_v33 }
  0x1d   :  { %1604 = vmatmul.mubr.msk.f32.vlgmr.msra.gmra.mrb[2].mxu1 %vm105_vm0, %v2205_v26  ;;  %1787 = vmatpush3.msk.msra.mxu0 %vm405_vm1, %v393_v52  ;;  %v636_v37 = vld [vmem:[%s2984_s17 + $0xc8] sm:$0xff]  ;;  %v666_v39 = vld [vmem:[%s2984_s17 + $0x1b8] sm:$0xff]  ;;  %v1904_v41 = vpack.c.bf16 %v648_v35, %v647_v31  ;;  %v649_v42 = vld [vmem:[%s2984_s17 + $0x130] sm:$0xff] }
  0x1e   :  { %1858 = vmatpush3.bf16.msra.mxu1 %v1857_v55  ;;  %1788 = vmatprep.mubr.msk.f32.mxu0 %vm2047_vm3, %v2045_v3  ;;  %v1878_v43 = vpack.c.bf16 %v636_v37, %v635_v36  ;;  %v619_v44 = vld [vmem:[%s2984_s17 + $0x40] sm:$0xff]  ;;  %v620_v45 = vld [vmem:[%s2984_s17 + $0x48] sm:$0xff]  ;;  %v1906_v46 = vpack.c.bf16 %v666_v39, %v665_v38  ;;  %v650_v47 = vld [vmem:[%s2984_s17 + $0x138] sm:$0xff]  ;;  %v555_v36 = vlaneseq }
  0x1f   :  { %1859 = vmatprep.subr.bf16.mxu1 %v2046_v59  ;;  %1799 = vmatprep.mubr.msk.f32.mxu1 %vm2047_vm3, %v2045_v3  ;;  %v637_v48 = vld [vmem:[%s2984_s17 + $0xd0] sm:$0xff]  ;;  %v638_v49 = vld [vmem:[%s2984_s17 + $0xd8] sm:$0xff]  ;;  %v667_v50 = vld [vmem:[%s2984_s17 + $0x1c0] sm:$0xff]  ;;  %v1880_v52 = vpack.c.bf16 %v620_v45, %v619_v44  ;;  %v1908_v53 = vpack.c.bf16 %v650_v47, %v649_v42 }
  0x20   :  { %1789 = vmatmul.mubr.msk.f32.vlgmr.msra.gmra.mrb[4].mxu0 %vm401_vm2, %v63_v2  ;;  %1863 = vmatprep.subr.bf16.mxu0 %v1862_v63  ;;  %v668_v51 = vld [vmem:[%s2984_s17 + $0x1c8] sm:$0xff]  ;;  %v1882_v55 = vpack.c.bf16 %v638_v49, %v637_v48  ;;  %v621_v56 = vld [vmem:[%s2984_s17 + $0x50] sm:$0xff]  ;;  %v622_v57 = vld [vmem:[%s2984_s17 + $0x58] sm:$0xff]  ;;  %v2494_v37 = vshrl.u32 %v555_v36, 7 }
  0x21   :  { %1865 = vmatpush3.bf16.msra.mxu0 %v1864_v4  ;;  %v1910_v58 = vpack.c.bf16 %v668_v51, %v667_v50  ;;  %v652_v60 = vld [vmem:[%s2984_s17 + $0x148] sm:$0xff]  ;;  %v639_v61 = vld [vmem:[%s2984_s17 + $0xe0] sm:$0xff]  ;;  %v669_v63 = vld [vmem:[%s2984_s17 + $0x1d0] sm:$0xff]  ;;  %v1884_v1 = vpack.c.bf16 %v622_v57, %v621_v56 }
  0x22   :  { %1861 = vmatpush3.bf16.msra.mxu1 %v1860_v5  ;;  %1867 = vmatprep.subr.bf16.mxu0 %v1866_v7  ;;  %v640_v62 = vld [vmem:[%s2984_s17 + $0xe8] sm:$0xff]  ;;  %v670_v0 = vld [vmem:[%s2984_s17 + $0x1d8] sm:$0xff]  ;;  %v1912_v2 = vpack.c.bf16 %v652_v60, %v651_v54  ;;  %v623_v5 = vld [vmem:[%s2984_s17 + $0x60] sm:$0xff]  ;;  %v557_v38 = vsub.s32 0, %v2494_v37  ;;  %v569_v42 = vsub.s32 3, %v2494_v37 }
  0x23   :  { %1895 = vmatprep.subr.bf16.mxu1 %v1894_v10  ;;  %v1886_v4 = vpack.c.bf16 %v640_v62, %v639_v61  ;;  %v624_v6 = vld [vmem:[%s2984_s17 + $0x68] sm:$0xff]  ;;  %v1914_v7 = vpack.c.bf16 %v670_v0, %v669_v63  ;;  %v653_v8 = vld [vmem:[%s2984_s17 + $0x150] sm:$0xff]  ;;  %v654_v9 = vld [vmem:[%s2984_s17 + $0x158] sm:$0xff] }
  0x24   :  { %v671_v10 = vld [vmem:[%s2984_s17 + $0x1e0] sm:$0xff]  ;;  %v672_v11 = vld [vmem:[%s2984_s17 + $0x1e8] sm:$0xff]  ;;  %v1888_v12 = vpack.c.bf16 %v624_v6, %v623_v5  ;;  %v1916_v13 = vpack.c.bf16 %v654_v9, %v653_v8  ;;  %v641_v18 = vld [vmem:[%s2984_s17 + $0xf0] sm:$0xff]  ;;  %v585_v6 = vsub.s32 7, %v2494_v37 }
  0x25   :  { %1800 = vmatmul.mubr.msk.f32.vlgmr.msra.gmra.mrb[4].mxu1 %vm105_vm0, %v2205_v26  ;;  %1869 = vmatpush3.bf16.msra.mxu0 %v1868_v16  ;;  %v1902_v26 = vpack.c.bf16 %v664_v28, %v663_v27  ;;  %v1918_v14 = vpack.c.bf16 %v672_v11, %v671_v10  ;;  %v655_v15 = vld [vmem:[%s2984_s17 + $0x160] sm:$0xff]  ;;  %v656_v16 = vld [vmem:[%s2984_s17 + $0x168] sm:$0xff]  ;;  %v673_v20 = vld [vmem:[%s2984_s17 + $0x1f0] sm:$0xff] }
  0x26   :  { %1897 = vmatpush3.bf16.msra.mxu1 %v1896_v17  ;;  %1871 = vmatprep.subr.bf16.mxu0 %v1870_v19  ;;  %v1920_v17 = vpack.c.bf16 %v656_v16, %v655_v15  ;;  %v642_v19 = vld [vmem:[%s2984_s17 + $0xf8] sm:$0xff]  ;;  %v625_v23 = vld [vmem:[%s2984_s17 + $0x70] sm:$0xff]  ;;  %v691_v31 = vld [vmem:[%s2984_s17 + $0x280] sm:$0xff] }
  0x27   :  { %1899 = vmatprep.subr.bf16.mxu1 %v1898_v22  ;;  %v1890_v21 = vpack.c.bf16 %v642_v19, %v641_v18  ;;  %v674_v22 = vld [vmem:[%s2984_s17 + $0x1f8] sm:$0xff]  ;;  %v657_v28 = vld [vmem:[%s2984_s17 + $0x170] sm:$0xff]  ;;  %v723_v33 = vld [vmem:[%s2984_s17 + $0x380] sm:$0xff] }
  0x28   :  { %v626_v24 = vld [vmem:[%s2984_s17 + $0x78] sm:$0xff]  ;;  %v1922_v25 = vpack.c.bf16 %v674_v22, %v673_v20  ;;  %v724_v34 = vld [vmem:[%s2984_s17 + $0x388] sm:$0xff]  ;;  %v2500_v39 = vld [vmem:[%s2986_s10] sm:$0xff] }
  0x29   :  { %1873 = vmatpush3.bf16.msra.mxu0 %v1872_v29  ;;  %v1892_v27 = vpack.c.bf16 %v626_v24, %v625_v23  ;;  %v658_v29 = vld [vmem:[%s2984_s17 + $0x178] sm:$0xff]  ;;  %v1958_v35 = vpack.c.bf16 %v724_v34, %v723_v33  ;;  %v2512_v47 = vld [vmem:[%s2987_s2] sm:$0xff]  ;;  %v2519_v49 = vld [vmem:[%s2987_s2 + $0x10] sm:$0xff]  ;;  %v586_v24 = vrot.slane %v2500_v39, %v585_v6 }
  0x2a   :  { %1901 = vmatpush3.bf16.msra.mxu1 %v1900_v30  ;;  %1875 = vmatprep.subr.bf16.mxu0 %v1874_v32  ;;  %v1924_v30 = vpack.c.bf16 %v658_v29, %v657_v28  ;;  %v692_v32 = vld [vmem:[%s2984_s17 + $0x288] sm:$0xff]  ;;  %v2529_v51 = vld [vmem:[%s2987_s2 + $0x18] sm:$0xff]  ;;  %v707_v57 = vld [vmem:[%s2984_s17 + $0x300] sm:$0xff] }
  0x2b   :  { %1903 = vmatprep.subr.bf16.mxu1 %v1902_v26  ;;  %v1926_v26 = vpack.c.bf16 %v692_v32, %v691_v31  ;;  %v2524_v50 = vld [vmem:[%s2987_s2 + $0x8] sm:$0xff]  ;;  %v693_v63 = vld [vmem:[%s2984_s17 + $0x290] sm:$0xff]  ;;  %v694_v0 = vld [vmem:[%s2984_s17 + $0x298] sm:$0xff] }
  0x2c   :  { %v676_v56 = vld [vmem:[%s2984_s17 + $0x208] sm:$0xff]  ;;  %v726_v5 = vld [vmem:[%s2984_s17 + $0x398] sm:$0xff]  ;;  %v709_v16 = vld [vmem:[%s2984_s17 + $0x310] sm:$0xff] }
  0x2d   :  { %1877 = vmatpush3.bf16.msra.mxu0 %v1876_v40  ;;  %v565_v40 = vsub.s32 2, %v2494_v37  ;;  %v708_v62 = vld [vmem:[%s2984_s17 + $0x308] sm:$0xff]  ;;  %v678_v15 = vld [vmem:[%s2984_s17 + $0x218] sm:$0xff]  ;;  %v695_v19 = vld [vmem:[%s2984_s17 + $0x2a0] sm:$0xff] }
  0x2e   :  { %1905 = vmatpush3.bf16.msra.mxu1 %v1904_v41  ;;  %1879 = vmatprep.subr.bf16.mxu0 %v1878_v43  ;;  %v561_v41 = vsub.s32 1, %v2494_v37  ;;  %v558_v43 = vrot.slane %v2500_v39, %v557_v38  ;;  %v710_v18 = vld [vmem:[%s2984_s17 + $0x318] sm:$0xff]  ;;  %v696_v20 = vld [vmem:[%s2984_s17 + $0x2a8] sm:$0xff]  ;;  %v727_v22 = vld [vmem:[%s2984_s17 + $0x3a0] sm:$0xff] }
  0x2f   :  { %1907 = vmatprep.subr.bf16.mxu1 %v1906_v46  ;;  %v566_v44 = vrot.slane %v2500_v39, %v565_v40  ;;  %v570_v46 = vrot.slane %v2500_v39, %v569_v42  ;;  %v728_v23 = vld [vmem:[%s2984_s17 + $0x3a8] sm:$0xff]  ;;  %v1934_v31 = vpack.c.bf16 %v696_v20, %v695_v19  ;;  %v711_v32 = vld [vmem:[%s2984_s17 + $0x320] sm:$0xff]  ;;  %v697_v38 = vld [vmem:[%s2984_s17 + $0x2b0] sm:$0xff] }
  0x30   :  { %v562_v45 = vrot.slane %v2500_v39, %v561_v41  ;;  %v680_v28 = vld [vmem:[%s2984_s17 + $0x228] sm:$0xff]  ;;  %v1966_v36 = vpack.c.bf16 %v728_v23, %v727_v22  ;;  %v698_v40 = vld [vmem:[%s2984_s17 + $0x2b8] sm:$0xff]  ;;  %v699_v6 = vld [vmem:[%s2984_s17 + $0x2c0] sm:$0xff] }
  0x31   :  { %1881 = vmatpush3.bf16.msra.mxu0 %v1880_v52  ;;  %v712_v33 = vld [vmem:[%s2984_s17 + $0x328] sm:$0xff]  ;;  %v2630_v42 = vld [vmem:[%s2987_s2 + $0x38] sm:$0xff]  ;;  %v701_v20 = vld [vmem:[%s2984_s17 + $0x2d0] sm:$0xff] }
  0x32   :  { %1909 = vmatpush3.bf16.msra.mxu1 %v1908_v53  ;;  %1883 = vmatprep.subr.bf16.mxu0 %v1882_v55  ;;  %v675_v55 = vld [vmem:[%s2984_s17 + $0x200] sm:$0xff]  ;;  %v2614_v34 = vld [vmem:[%s2987_s2 + $0x28] sm:$0xff] }
  0x33   :  { %1911 = vmatprep.subr.bf16.mxu1 %v1910_v58  ;;  %v1928_v9 = vpack.c.bf16 %v676_v56, %v675_v55  ;;  %v716_v19 = vld [vmem:[%s2984_s17 + $0x348] sm:$0xff] }
  0x35   :  { %1885 = vmatpush3.bf16.msra.mxu0 %v1884_v1  ;;  %v577_v1 = vsub.s32 5, %v2494_v37 }
  0x36   :  { %1913 = vmatpush3.bf16.msra.mxu1 %v1912_v2  ;;  %1887 = vmatprep.subr.bf16.mxu0 %v1886_v4  ;;  %v725_v4 = vld [vmem:[%s2984_s17 + $0x390] sm:$0xff] }
  0x37   :  { %1915 = vmatprep.subr.bf16.mxu1 %v1914_v7 }
  0x39   :  { %1889 = vmatpush3.bf16.msra.mxu0 %v1888_v12  ;;  %v1960_v12 = vpack.c.bf16 %v708_v62, %v707_v57  ;;  %v681_v62 = vld [vmem:[%s2984_s17 + $0x230] sm:$0xff] }
  0x3a   :  { %1917 = vmatpush3.bf16.msra.mxu1 %v1916_v13  ;;  %1891 = vmatprep.subr.bf16.mxu0 %v1890_v21  ;;  %v1930_v13 = vpack.c.bf16 %v694_v0, %v693_v63  ;;  %v578_v21 = vrot.slane %v2500_v39, %v577_v1  ;;  %v682_v63 = vld [vmem:[%s2984_s17 + $0x238] sm:$0xff]  ;;  %v713_v0 = vld [vmem:[%s2984_s17 + $0x330] sm:$0xff] }
  0x3b   :  { %1919 = vmatprep.subr.bf16.mxu1 %v1918_v14  ;;  %v677_v14 = vld [vmem:[%s2984_s17 + $0x210] sm:$0xff] }
  0x3d   :  { %1893 = vmatpush3.bf16.msra.mxu0 %v1892_v27  ;;  %v679_v27 = vld [vmem:[%s2984_s17 + $0x220] sm:$0xff] }
  0x3e   :  { %1921 = vmatpush3.bf16.msra.mxu1 %v1920_v17  ;;  %1927 = vmatprep.subr.bf16.mxu0 %v1926_v26  ;;  %v1962_v17 = vpack.c.bf16 %v726_v5, %v725_v4  ;;  %v1936_v55 = vpack.c.bf16 %v680_v28, %v679_v27  ;;  %v714_v5 = vld [vmem:[%s2984_s17 + $0x338] sm:$0xff] }
  0x3f   :  { %1923 = vmatprep.subr.bf16.mxu1 %v1922_v25  ;;  %v1932_v25 = vpack.c.bf16 %v678_v15, %v677_v14  ;;  %v683_v14 = vld [vmem:[%s2984_s17 + $0x240] sm:$0xff]  ;;  %v684_v15 = vld [vmem:[%s2984_s17 + $0x248] sm:$0xff] }
  0x40   :  { %v1944_v27 = vpack.c.bf16 %v684_v15, %v683_v14 }
  0x42   :  { %1925 = vmatpush3.bf16.msra.mxu1 %v1924_v30  ;;  %v1964_v30 = vpack.c.bf16 %v710_v18, %v709_v16  ;;  %v715_v16 = vld [vmem:[%s2984_s17 + $0x340] sm:$0xff] }
  0x43   :  { %1959 = vmatprep.subr.bf16.mxu1 %v1958_v35  ;;  %v1976_v28 = vpack.c.bf16 %v716_v19, %v715_v16  ;;  %v2770_v19 = vld [vmem:[%s2987_s2 + $0x20] sm:$0xff] }
  0xe7   :  { %v2514_v48 = vpop.f32.mrb[0].mxu0 }
  0xe8   :  { %v595_v52 = vmul.f32 %v558_v43, %v2514_v48  ;;  %v2532_v53 = vpop.f32.mrb[0].mxu1  ;;  %v2534_v54 = vpop.f32.mrb[1].mxu0 }
  0xe9   :  { %v597_v58 = vmul.f32 %v566_v44, %v2532_v53  ;;  %v596_v60 = vmul.f32 %v562_v45, %v2534_v54  ;;  %v2547_v61 = vpop.f32.mrb[1].mxu1  ;;  %v729_v44 = vld [vmem:[%s2984_s17 + $0x3b0] sm:$0xff]  ;;  %v730_v45 = vld [vmem:[%s2984_s17 + $0x3b8] sm:$0xff] }
  0xea   :  { %v598_v2 = vmul.f32 %v570_v46, %v2547_v61  ;;  %v603_v10 = vmul.f32 %v595_v52, %v2512_v47  ;;  %v1605_v52 = vld [vmem:[%s2988_s4] ss:$0 sm:$0xff]  ;;  %v1970_v4 = vpack.c.bf16 %v730_v45, %v729_v44  ;;  %v736_v45 = vld [vmem:[%s2984_s17 + $0x3e8] sm:$0xff] }
  0xeb   :  { %v605_v7 = vmul.f32 %v597_v58, %v2519_v49  ;;  %v604_v8 = vmul.f32 %v596_v60, %v2524_v50  ;;  %v1968_v58 = vpack.c.bf16 %v712_v33, %v711_v32  ;;  %v1938_v60 = vpack.c.bf16 %v698_v40, %v697_v38  ;;  %v686_v32 = vld [vmem:[%s2984_s17 + $0x258] sm:$0xff]  ;;  %v717_v33 = vld [vmem:[%s2984_s17 + $0x350] sm:$0xff]  ;;  %v703_v40 = vld [vmem:[%s2984_s17 + $0x2e0] sm:$0xff] }
  0xec   :  { %v606_v11 = vmul.f32 %v598_v2, %v2529_v51  ;;  %v718_v38 = vld [vmem:[%s2984_s17 + $0x358] sm:$0xff]  ;;  %v735_v44 = vld [vmem:[%s2984_s17 + $0x3e0] sm:$0xff] }
  0xed   :  { %803 = vmatprep.mubr.f32.mxu0 %v604_v8 }
  0xee   :  { %873 = vmatprep.mubr.f32.mxu1 %v606_v11  ;;  %804 = vmatmul.mubr.f32.vlgmr.msra.gmra.mrb[6].mxu0 %v603_v10  ;;  %v732_v10 = vld [vmem:[%s2984_s17 + $0x3c8] sm:$0xff]  ;;  %v1940_v11 = vpack.c.bf16 %v682_v63, %v681_v62  ;;  %v719_v62 = vld [vmem:[%s2984_s17 + $0x360] sm:$0xff]  ;;  %v1982_v63 = vpack.c.bf16 %v736_v45, %v735_v44 }
  0xef   :  { %874 = vmatmul.mubr.f32.vlgmr.msra.gmra.mrb[6].mxu1 %v605_v7  ;;  %1929 = vmatpush3.bf16.msra.mxu0 %v1928_v9  ;;  %v2603_v29 = vpop.f32.mrb[2].mxu0  ;;  %v700_v7 = vld [vmem:[%s2984_s17 + $0x2c8] sm:$0xff]  ;;  %v731_v9 = vld [vmem:[%s2984_s17 + $0x3c0] sm:$0xff] }
  0xf0   :  { %1961 = vmatpush3.bf16.msra.mxu1 %v1960_v12  ;;  %1931 = vmatprep.subr.bf16.mxu0 %v1930_v13  ;;  %v2616_v26 = vpop.f32.mrb[3].mxu0  ;;  %v2618_v35 = vpop.f32.mrb[2].mxu1  ;;  %v1972_v12 = vpack.c.bf16 %v714_v5, %v713_v0  ;;  %v1942_v13 = vpack.c.bf16 %v700_v7, %v699_v6  ;;  %v1974_v18 = vpack.c.bf16 %v732_v10, %v731_v9  ;;  %v720_v0 = vld [vmem:[%s2984_s17 + $0x368] sm:$0xff]  ;;  %v689_v10 = vld [vmem:[%s2984_s17 + $0x270] sm:$0xff] }
  0xf1   :  { %1963 = vmatprep.subr.bf16.mxu1 %v1962_v17  ;;  %v600_v41 = vmul.f32 %v578_v21, %v2616_v26  ;;  %v2632_v43 = vpop.f32.mrb[3].mxu1  ;;  %v702_v21 = vld [vmem:[%s2984_s17 + $0x2d8] sm:$0xff] }
  0xf2   :  { %v602_v46 = vmul.f32 %v586_v24, %v2632_v43  ;;  %v733_v24 = vld [vmem:[%s2984_s17 + $0x3d0] sm:$0xff] }
  0xf3   :  { %1933 = vmatpush3.bf16.msra.mxu0 %v1932_v25  ;;  %v608_v56 = vmul.f32 %v600_v41, %v2614_v34  ;;  %v475_v57 = vpop.f32.mrb[4].mxu0  ;;  %v734_v25 = vld [vmem:[%s2984_s17 + $0x3d8] sm:$0xff]  ;;  %v704_v41 = vld [vmem:[%s2984_s17 + $0x2e8] sm:$0xff] }
  0xf4   :  { %1965 = vmatpush3.bf16.msra.mxu1 %v1964_v30  ;;  %1935 = vmatprep.subr.bf16.mxu0 %v1934_v31  ;;  %v610_v1 = vmul.f32 %v602_v46, %v2630_v42  ;;  %v1790_v2 = vpop.f32.mrb[5].mxu0  ;;  %v476_v8 = vadd.f32 %v1605_v52, %v475_v57  ;;  %v1946_v30 = vpack.c.bf16 %v702_v21, %v701_v20  ;;  %v685_v31 = vld [vmem:[%s2984_s17 + $0x250] sm:$0xff]  ;;  %v581_v52 = vsub.s32 6, %v2494_v37 }
  0xf5   :  { %1967 = vmatprep.subr.bf16.mxu1 %v1966_v36  ;;  %943 = vmatprep.mubr.f32.mxu0 %v608_v56  ;;  %v1978_v36 = vpack.c.bf16 %v734_v25, %v733_v24  ;;  %v1948_v46 = vpack.c.bf16 %v686_v32, %v685_v31  ;;  %v573_v56 = vsub.s32 4, %v2494_v37  ;;  %v1950_v57 = vpack.c.bf16 %v704_v41, %v703_v40  ;;  %v705_v37 = vld [vmem:[%s2984_s17 + $0x2f0] sm:$0xff]  ;;  %v1023_v24 = vld [vmem:[%s2989_s5 + $0x8] sm:$0xff] }
  0xf6   :  { %1013 = vmatprep.mubr.f32.mxu1 %v610_v1  ;;  %v706_v1 = vld [vmem:[%s2984_s17 + $0x2f8] sm:$0xff]  ;;  %v737_v2 = vld [vmem:[%s2984_s17 + $0x3f0] sm:$0xff]  ;;  %v582_v5 = vrot.slane %v2500_v39, %v581_v52 }
  0xf7   :  { %1937 = vmatpush3.bf16.msra.mxu0 %v1936_v55  ;;  %v1980_v55 = vpack.c.bf16 %v718_v38, %v717_v33  ;;  %v574_v7 = vrot.slane %v2500_v39, %v573_v56  ;;  %v1954_v9 = vpack.c.bf16 %v706_v1, %v705_v37  ;;  %v722_v39 = vld [vmem:[%s2984_s17 + $0x378] sm:$0xff]  ;;  %v1024_v25 = vld [vmem:[%s2989_s5 + $0x10] sm:$0xff] }
  0xf8   :  { %1969 = vmatpush3.bf16.msra.mxu1 %v1968_v58  ;;  %1939 = vmatprep.subr.bf16.mxu0 %v1938_v60  ;;  %v549_v17 = vpop.f32.mrb[4].mxu1  ;;  %v687_v58 = vld [vmem:[%s2984_s17 + $0x260] sm:$0xff]  ;;  %v688_v60 = vld [vmem:[%s2984_s17 + $0x268] sm:$0xff]  ;;  %v601_v14 = vmul.f32 %v582_v5, %v2618_v35  ;;  %v1109_v37 = vld [vmem:[%s2990_s7 + $0x10] sm:$0xff] }
  0xf9   :  { %1971 = vmatprep.subr.bf16.mxu1 %v1970_v4  ;;  %v2688_v22 = vadd.f32 %v549_v17, %v476_v8  ;;  %v1801_v23 = vpop.f32.mrb[5].mxu1  ;;  %v738_v4 = vld [vmem:[%s2984_s17 + $0x3f8] sm:$0xff]  ;;  %v1952_v6 = vpack.c.bf16 %v688_v60, %v687_v58  ;;  %v1984_v8 = vpack.c.bf16 %v720_v0, %v719_v62  ;;  %v599_v16 = vmul.f32 %v574_v7, %v2603_v29  ;;  %v2765_v17 = vld [vmem:[%s2987_s2 + $0x30] sm:$0xff]  ;;  %v1108_v0 = vld [vmem:[%s2990_s7 + $0x8] sm:$0xff] }
  0xfa   :  { %v609_v20 = vmul.f32 %v601_v14, %v2765_v17  ;;  %v1022_v23 = vld [vmem:[%s2989_s5] sm:$0xff] }
  0xfb   :  { %1941 = vmatpush3.bf16.msra.mxu0 %v1940_v11  ;;  %v690_v11 = vld [vmem:[%s2984_s17 + $0x278] sm:$0xff]  ;;  %v607_v21 = vmul.f32 %v599_v16, %v2770_v19  ;;  %v1235_v16 = vld [vmem:[%s2996_s16 + $0x8] sm:$0xff] }
  0xfc   :  { %1973 = vmatpush3.bf16.msra.mxu1 %v1972_v12  ;;  %1943 = vmatprep.subr.bf16.mxu0 %v1942_v13  ;;  %v1986_v12 = vpack.c.bf16 %v738_v4, %v737_v2  ;;  %v721_v13 = vld [vmem:[%s2984_s17 + $0x370] sm:$0xff]  ;;  %v1956_v15 = vpack.c.bf16 %v690_v11, %v689_v10  ;;  %v1609_v4 = vld [vmem:[%s2991_s6] ss:$0 sm:$0xff] }
  0xfd   :  { %1975 = vmatprep.subr.bf16.mxu1 %v1974_v18  ;;  %v1988_v18 = vpack.c.bf16 %v722_v39, %v721_v13  ;;  %v1613_v11 = vld [vmem:[%s2994_s11] ss:$0 sm:$0xff] }
  0xff   :  { %1945 = vmatpush3.bf16.msra.mxu0 %v1944_v27  ;;  %v1991_v27 = vpack.c.bf16 %v1023_v24, %v1022_v23  ;;  %v1245_v23 = vld [vmem:[%s2996_s16 + $0x58] sm:$0xff]  ;;  %v1234_v24 = vld [vmem:[%s2996_s16] sm:$0xff] }
 0x100   :  { %1977 = vmatpush3.bf16.msra.mxu1 %v1976_v28  ;;  %1947 = vmatprep.subr.bf16.mxu0 %v1946_v30  ;;  %v1025_v28 = vld [vmem:[%s2989_s5 + $0x18] sm:$0xff] }
 0x101   :  { %1979 = vmatprep.subr.bf16.mxu1 %v1978_v36  ;;  %v1994_v30 = vpack.c.bf16 %v1025_v28, %v1024_v25  ;;  %v1242_v25 = vld [vmem:[%s2996_s16 + $0x40] sm:$0xff] }
 0x102   :  { %v2004_v28 = vpack.c.bf16 %v1242_v25, %v1234_v24 }
 0x103   :  { %1949 = vmatpush3.bf16.msra.mxu0 %v1948_v46 }
 0x104   :  { %1981 = vmatpush3.bf16.msra.mxu1 %v1980_v55  ;;  %1951 = vmatprep.subr.bf16.mxu0 %v1950_v57 }
 0x105   :  { %1983 = vmatprep.subr.bf16.mxu1 %v1982_v63  ;;  %v1107_v63 = vld [vmem:[%s2990_s7] sm:$0xff] }
 0x106   :  { %v1997_v1 = vpack.c.bf16 %v1108_v0, %v1107_v63  ;;  %v1239_v0 = vld [vmem:[%s2996_s16 + $0x28] sm:$0xff] }
 0x107   :  { %1953 = vmatpush3.bf16.msra.mxu0 %v1952_v6 }
 0x108   :  { %1985 = vmatpush3.bf16.msra.mxu1 %v1984_v8  ;;  %1955 = vmatprep.subr.bf16.mxu0 %v1954_v9  ;;  %v25_v9 = vstv %s2992_s12 }
 0x109   :  { %1987 = vmatprep.subr.bf16.mxu1 %v1986_v12  ;;  %26 = vst [vmem:[#allocation2] sm:$0x1] %v25_v9  ;;  %v1246_v9 = vld [vmem:[%s2996_s16 + $0x60] sm:$0xff] }
 0x10b   :  { %1957 = vmatpush3.bf16.msra.mxu0 %v1956_v15  ;;  %v2048_v15 = vmov 0  }
 0x10c   :  { %1989 = vmatpush3.bf16.msra.mxu1 %v1988_v18  ;;  %1990 = vmatprep.subr.bf16.mxu0 %v2046_v59  ;;  %v1243_v18 = vld [vmem:[%s2996_s16 + $0x48] sm:$0xff] }
 0x10d   :  { %1996 = vmatprep.subr.bf16.mxu1 %v2046_v59  ;;  %2038 = vset.pattern.permute.xlu0 %v2048_v15  ;;  %v1265_v15 = vld [vmem:[%s2996_s16 + $0xf8] sm:$0xff] }
 0x10e   :  { %944 = vmatmul.mubr.f32.vlgmr.msra.gmra.mrb[8].mxu0 %v607_v21  ;;  %v2002_v21 = vpack.c.bf16 %v1243_v18, %v1235_v16 }
 0x10f   :  { %1014 = vmatmul.mubr.f32.vlgmr.msra.gmra.mrb[8].mxu1 %v609_v20  ;;  %1810 = vmatprep.mubr.msk.f32.mxu0 %vm2047_vm3, %v2045_v3  ;;  %v1237_v20 = vld [vmem:[%s2996_s16 + $0x18] sm:$0xff] }
 0x110   :  { %1821 = vmatprep.mubr.msk.f32.mxu1 %vm2047_vm3, %v2045_v3  ;;  %1992 = vmatpush3.bf16.msra.mxu0 %v1991_v27  ;;  %v2010_v27 = vpack.c.bf16 %v1245_v23, %v1237_v20 }
 0x111   :  { %1993 = vmatprep.subr.bf16.mxu0 %v2046_v59  ;;  %1998 = vmatpush3.bf16.msra.mxu1 %v1997_v1  ;;  %v1241_v1 = vld [vmem:[%s2996_s16 + $0x38] sm:$0xff] }
 0x112   :  { %1999 = vmatprep.subr.bf16.mxu1 %v2046_v59  ;;  %v1611_v59 = vld [vmem:[%s2993_s8] ss:$0 sm:$0xff] }
 0x114   :  { %1995 = vmatpush3.bf16.msra.mxu0 %v1994_v30  ;;  %v1236_v30 = vld [vmem:[%s2996_s16 + $0x10] sm:$0xff] }
 0x115   :  { %2003 = vmatprep.subr.bf16.mxu0 %v2002_v21  ;;  %v1254_v21 = vld [vmem:[%s2996_s16 + $0xa0] sm:$0xff] }
 0x1c1   :  { %v1668_v31 = vpop.f32.mrb[6].mxu0 }
 0x1c2   :  { %v1703_v32 = vpop.f32.mrb[6].mxu1  ;;  %v1669_v33 = vpop.f32.mrb[7].mxu0 }
 0x1c3   :  { %v1670_v36 = vadd.f32 %v1669_v33, %v1668_v31  ;;  %v1704_v38 = vpop.f32.mrb[7].mxu1  ;;  %v1244_v31 = vld [vmem:[%s2996_s16 + $0x50] sm:$0xff]  ;;  %v1614_v33 = vld [vmem:[#allocation2] ss:$0 sm:$0xff] }
 0x1c4   :  { %v1705_v40 = vadd.f32 %v1704_v38, %v1703_v32  ;;  %v2012_v32 = vpack.c.bf16 %v1244_v31, %v1236_v30  ;;  %v1264_v30 = vld [vmem:[%s2996_s16 + $0xf0] sm:$0xff] }
 0x1c6   :  { %v876_v41 = vadd.f32 %v1705_v40, %v1670_v36 }
 0x1e1   :  { %v1738_v44 = vpop.f32.mrb[8].mxu0 }
 0x1e2   :  { %v1773_v45 = vpop.f32.mrb[8].mxu1  ;;  %v1739_v46 = vpop.f32.mrb[9].mxu0 }
 0x1e3   :  { %v1740_v52 = vadd.f32 %v1739_v46, %v1738_v44  ;;  %v1774_v55 = vpop.f32.mrb[9].mxu1  ;;  %v1259_v44 = vld [vmem:[%s2996_s16 + $0xc8] sm:$0xff] }
 0x1e4   :  { %v1775_v56 = vadd.f32 %v1774_v55, %v1773_v45  ;;  %v1253_v45 = vld [vmem:[%s2996_s16 + $0x98] sm:$0xff]  ;;  %v1250_v55 = vld [vmem:[%s2996_s16 + $0x80] sm:$0xff] }
 0x1e5   :  { %v946_v57 = vadd.f32 %v1740_v52, %v876_v41  ;;  %v1251_v41 = vld [vmem:[%s2996_s16 + $0x88] sm:$0xff]  ;;  %v1261_v52 = vld [vmem:[%s2996_s16 + $0xd8] sm:$0xff] }
 0x1e6   :  { %v2006_v46 = vpack.c.bf16 %v1259_v44, %v1251_v41 }
 0x1e7   :  { %v1016_v58 = vadd.f32 %v1775_v56, %v946_v57  ;;  %v1258_v56 = vld [vmem:[%s2996_s16 + $0xc0] sm:$0xff]  ;;  %v2014_v57 = vpack.c.bf16 %v1261_v52, %v1253_v45 }
 0x1e9   :  { %v1020_v60 = vadd.f32 %v2688_v22, %v1016_v58  ;;  %v1110_v22 = vld [vmem:[%s2990_s7 + $0x18] sm:$0xff]  ;;  %v2008_v58 = vpack.c.bf16 %v1258_v56, %v1250_v55 }
 0x1ea   :  { %v2000_v2 = vpack.c.bf16 %v1110_v22, %v1109_v37  ;;  %v1247_v37 = vld [vmem:[%s2996_s16 + $0x68] sm:$0xff] }
 0x1eb   :  { %2039 = vtanh.f32 %v1020_v60  ;;  %v1252_v60 = vld [vmem:[%s2996_s16 + $0x90] sm:$0xff]  ;;  %v2018_v22 = vpack.c.bf16 %v1247_v37, %v1239_v0 }
 0x1ec   :  { %2001 = vmatpush3.bf16.msra.mxu1 %v2000_v2  ;;  %v1249_v2 = vld [vmem:[%s2996_s16 + $0x78] sm:$0xff] }
 0x1ed   :  { %2011 = vmatprep.subr.bf16.mxu1 %v2010_v27  ;;  %v1262_v27 = vld [vmem:[%s2996_s16 + $0xe0] sm:$0xff] }
 0x1f5   :  { %v2040_v62 = vpop.eup %2039 }
 0x1f6   :  { %1811 = vmatmul.mubr.msk.f32.vlgmr.msra.gmra.mrb[10].mxu0 %vm105_vm0, %v2040_v62  ;;  %v1260_v62 = vld [vmem:[%s2996_s16 + $0xd0] sm:$0xff] }
 0x1f7   :  { %1333 = vmatprep.mubr.f32.mxu0 %v2045_v3  ;;  %2005 = vmatpush1.bf16.msra.mxu0 %v2004_v28  ;;  %v2016_v63 = vpack.c.bf16 %v1260_v62, %v1252_v60  ;;  %v1256_v28 = vld [vmem:[%s2996_s16 + $0xb0] sm:$0xff] }
 0x1f8   :  { %2007 = vmatprep.subr.bf16.mxu0 %v2006_v46  ;;  %v2032_v31 = vpack.c.bf16 %v1264_v30, %v1256_v28 }
 0x1fb   :  { %2009 = vmatpush1.bf16.msra.mxu0 %v2008_v58 }
 0x1fc   :  { %2019 = vmatprep.subr.bf16.mxu0 %v2018_v22 }
 0x2c9   :  { %v1102_v5 = vpop.f32.mrb[10].mxu0 }
 0x2ca   :  { %v1103_v6 = vadd.f32 %v1609_v4, %v1102_v5  ;;  %v1812_v7 = vpop.f32.mrb[11].mxu0  ;;  %v2026_v4 = vpack.c.bf16 %v1249_v2, %v1241_v1  ;;  %v1615_v5 = vld [vmem:[%s2997_s13] ss:$0 sm:$0xff] }
 0x2cc   :  { %2041 = vtanh.f32 %v1103_v6  ;;  %v1616_v6 = vld [vmem:[%s2998_s14] ss:$0 sm:$0xff] }
 0x2d6   :  { %v2042_v8 = vpop.eup %2041 }
 0x2d7   :  { %1822 = vmatmul.mubr.msk.f32.vlgmr.msra.gmra.mrb[10].mxu1 %vm105_vm0, %v2042_v8  ;;  %v1238_v8 = vld [vmem:[%s2996_s16 + $0x20] sm:$0xff] }
 0x2d8   :  { %1404 = vmatprep.mubr.f32.mxu1 %v2045_v3  ;;  %2013 = vmatpush1.bf16.msra.mxu1 %v2012_v32  ;;  %v2020_v18 = vpack.c.bf16 %v1246_v9, %v1238_v8 }
 0x2d9   :  { %2015 = vmatprep.subr.bf16.mxu1 %v2014_v57 }
 0x2dc   :  { %2017 = vmatpush1.bf16.msra.mxu1 %v2016_v63 }
 0x2dd   :  { %2027 = vmatprep.subr.bf16.mxu1 %v2026_v4 }
 0x3aa   :  { %v1187_v10 = vpop.f32.mrb[10].mxu1 }
 0x3ab   :  { %v2823_v12 = vadd.f32 %v1611_v59, %v1187_v10  ;;  %v1823_v13 = vpop.f32.mrb[11].mxu1  ;;  %v1240_v10 = vld [vmem:[%s2996_s16 + $0x30] sm:$0xff] }
 0x3ac   :  { %v1255_v13 = vld [vmem:[%s2996_s16 + $0xa8] sm:$0xff] }
 0x3ad   :  { %1191 = vst [vmem:[%s2995_s18] sm:$0xff] %v2823_v12  ;;  %v1199_v39 = vmul.f32 %v1613_v11, %v2823_v12  ;;  %v1248_v11 = vld [vmem:[%s2996_s16 + $0x70] sm:$0xff] }
 0x3ae   :  { %v2028_v20 = vpack.c.bf16 %v1248_v11, %v1240_v10 }
 0x3af   :  { %v1200_v14 = vsel %vm105_vm0, %v1199_v39, 0.0  ;;  %v1263_v39 = vld [vmem:[%s2996_s16 + $0xe8] sm:$0xff] }
 0x3b0   :  { %1201 = vadd.xlane.f32.xlu0 %v1200_v14  ;;  %v1257_v14 = vld [vmem:[%s2996_s16 + $0xb8] sm:$0xff]  ;;  %v2022_v24 = vpack.c.bf16 %v1263_v39, %v1255_v13 }
 0x3b1   :  { %v2030_v25 = vpack.c.bf16 %v1265_v15, %v1257_v14 }
 0x43d   :  { %v1202_v36 = vpop.xlane.xlu0 %1201 }
 0x43e   :  { %v1210_v38 = vadd.f32 %v1614_v33, %v1202_v36 }
 0x440   :  { %2043 = vtanh.f32 %v1210_v38 }
 0x44a   :  { %v2044_v40 = vpop.eup %2043 }
 0x44b   :  { %1215 = vperm.xlu0 %2038, %v2044_v40  }
 0x4ca   :  { %v1216_v7 = vpop.permute.xlu0 %1215 }
 0x4cb   :  { %v1224_v59 = vmul.f32 %v1615_v5, %v1216_v7 }
 0x4cd   :  { %v1232_v16 = vadd.f32 %v1616_v6, %v1224_v59 }
 0x4cf   :  { %v1233_v23 = vmul.f32 %v1232_v16, %v2823_v12  ;;  %v2024_v12 = vpack.c.bf16 %v1262_v27, %v1254_v21 }
 0x4d1   :  { %1617 = vmatmul.mubr.msk.f32.vlgmr.msra.gmra.mrb[12].mxu0 %vm105_vm0, %v1233_v23  ;;  %1618 = vmatmul.mubr.msk.f32.vlgmr.msra.gmra.mrb[12].mxu1 %vm105_vm0, %v1233_v23 }
 0x4d2   :  { %2021 = vmatpush1.bf16.msra.mxu0 %v2020_v18  ;;  %2029 = vmatpush1.bf16.msra.mxu1 %v2028_v20 }
 0x4d3   :  { %2023 = vmatprep.subr.bf16.mxu0 %v2022_v24  ;;  %2031 = vmatprep.subr.bf16.mxu1 %v2030_v25 }
 0x4d4   :  { %1475 = vmatprep.mubr.f32.mxu0 %v2045_v3  ;;  %1546 = vmatprep.mubr.f32.mxu1 %v2045_v3 }
 0x4d6   :  { %2025 = vmatpush1.bf16.msra.mxu0 %v2024_v12  ;;  %2033 = vmatpush1.bf16.msra.mxu1 %v2032_v31 }
 0x4d9   :  { %1619 = vmatmul.mubr.msk.f32.vlgmr.msra.gmra.mrb[14].mxu0 %vm105_vm0, %v1233_v23  ;;  %1620 = vmatmul.mubr.msk.f32.vlgmr.msra.gmra.mrb[14].mxu1 %vm105_vm0, %v1233_v23 }
 0x5a4   :  { %v1335_v32 = vpop.f32.mrb[12].mxu0  ;;  %v1406_v33 = vpop.f32.mrb[12].mxu1 }
 0x5a5   :  { %v1553_v36 = vmul.f32 %v1335_v32, %v2514_v48  ;;  %v1555_v38 = vmul.f32 %v1406_v33, %v2532_v53  ;;  %v1337_v40 = vpop.f32.mrb[13].mxu0  ;;  %v1408_v41 = vpop.f32.mrb[13].mxu1 }
 0x5a6   :  { %v1554_v44 = vmul.f32 %v1337_v40, %v2534_v54  ;;  %v1556_v45 = vmul.f32 %v1408_v41, %v2547_v61 }
 0x5a7   :  { %v1561_v3 = vadd.f32 %v1553_v36, %v2512_v47  ;;  %v1563_v46 = vadd.f32 %v1555_v38, %v2519_v49 }
 0x5a8   :  { %v1562_v52 = vadd.f32 %v1554_v44, %v2524_v50  ;;  %v1564_v55 = vadd.f32 %v1556_v45, %v2529_v51 }
 0x5a9   :  { %v1621_v56 = vclamps-f32 %v1561_v3, 2.0  ;;  %v1623_v57 = vclamps-f32 %v1563_v46, 2.0 }
 0x5aa   :  { %v1622_v58 = vclamps-f32 %v1562_v52, 2.0  ;;  %v1624_v48 = vclamps-f32 %v1564_v55, 2.0 }
 0x5ab   :  { %1585 = vst [vmem:[%s2999_s19] sm:$0xff] %v1621_v56  ;;  %1587 = vst [vmem:[%s2999_s19 + $0x10] sm:$0xff] %v1623_v57 }
 0x5ac   :  { %1586 = vst [vmem:[%s2999_s19 + $0x8] sm:$0xff] %v1622_v58  ;;  %1588 = vst [vmem:[%s2999_s19 + $0x18] sm:$0xff] %v1624_v48  ;;  %v1477_v47 = vpop.f32.mrb[14].mxu0  ;;  %v1548_v49 = vpop.f32.mrb[14].mxu1 }
 0x5ad   :  { %v1557_v50 = vmul.f32 %v1477_v47, %v2603_v29  ;;  %v1559_v51 = vmul.f32 %v1548_v49, %v2618_v35  ;;  %v1479_v53 = vpop.f32.mrb[15].mxu0  ;;  %v1550_v54 = vpop.f32.mrb[15].mxu1 }
 0x5ae   :  { %v1558_v61 = vmul.f32 %v1479_v53, %v2616_v26  ;;  %v1560_v60 = vmul.f32 %v1550_v54, %v2632_v43 }
 0x5af   :  { %v1565_v62 = vadd.f32 %v1557_v50, %v2770_v19  ;;  %v1567_v63 = vadd.f32 %v1559_v51, %v2765_v17 }
 0x5b0   :  { %v1566_v0 = vadd.f32 %v1558_v61, %v2614_v34  ;;  %v1568_v37 = vadd.f32 %v1560_v60, %v2630_v42 }
 0x5b1   :  { %v1625_v1 = vclamps-f32 %v1565_v62, 2.0  ;;  %v1627_v22 = vclamps-f32 %v1567_v63, 2.0 }
 0x5b2   :  { %v1626_v2 = vclamps-f32 %v1566_v0, 2.0  ;;  %v1628_v29 = vclamps-f32 %v1568_v37, 2.0 }
 0x5b3   :  { %1589 = vst [vmem:[%s2999_s19 + $0x20] sm:$0xff] %v1625_v1  ;;  %1591 = vst [vmem:[%s2999_s19 + $0x30] sm:$0xff] %v1627_v22 }
 0x5b4   :  { %1590 = vst [vmem:[%s2999_s19 + $0x28] sm:$0xff] %v1626_v2  ;;  %1592 = vst [vmem:[%s2999_s19 + $0x38] sm:$0xff] %v1628_v29 }

</bundles_post_ra>
